<compile_context>
chip_gen: v5e
topology: v5e:2x2
jax: 0.10.0
libtpu: 0.0.40
codegen_flags: <defaults>
</compile_context>

<pallas_src>
import functools

import jax
import jax.numpy as jnp
from jax.experimental import pallas as pl
from jax.experimental.pallas import tpu as pltpu


def _round_up(x, m):
    return ((x + m - 1) // m) * m


def mlp_proto_kernel(x_ref, w1_ref, b1_ref, w2_ref, b2_ref, o_ref):
    # x_ref:  (TM, F)   f32   current row tile (moves with grid)
    # w1_ref: (F,  Hp)  f32   resident
    # b1_ref: (1,  Hp)  f32   resident
    # w2_ref: (Hp, Hp)  f32   resident
    # b2_ref: (1,  Hp)  f32   resident
    # o_ref:  (TM, Hp)  f32
    x = x_ref[...]
    h = jnp.dot(x, w1_ref[...], preferred_element_type=jnp.float32)
    h = jnp.maximum(h + b1_ref[...], 0.0)                       # bias + ReLU in f32
    out = jnp.dot(h, w2_ref[...], preferred_element_type=jnp.float32) + b2_ref[...]
    o_ref[...] = out.astype(o_ref.dtype)


def prepare_params(w1, b1, w2, b2):
    """Pad/cast the constant parameters ONCE (hoisted out of the per-call path).

    Weights stored (in, out). Hidden/out dims are zero-padded to a lane-dense
    multiple of 128; zero padding is mathematically inert (padded weight rows/cols
    and biases are zero, ReLU(0)=0) and is sliced off in the forward wrapper.
    """
    F, H = w1.shape
    Hp = _round_up(H, 128)
    f32 = jnp.float32
    w1_p = jnp.zeros((F, Hp), f32).at[:, :H].set(w1.astype(f32))
    b1_p = jnp.zeros((1, Hp), f32).at[0, :H].set(b1.astype(f32))
    w2_p = jnp.zeros((Hp, Hp), f32).at[:H, :H].set(w2.astype(f32))
    b2_p = jnp.zeros((1, Hp), f32).at[0, :H].set(b2.astype(f32))
    return w1_p, b1_p, w2_p, b2_p


@functools.partial(jax.jit, static_argnames=("hidden",))
def mlp_proto_forward(inputs, w1_p, b1_p, w2_p, b2_p, *, hidden):
    """inputs: (B, S, in_features) -> (B, S, hidden). Params already padded."""
    B, S = inputs.shape[:2]
    F = inputs.shape[-1]
    Hp = w1_p.shape[1]
    f32 = jnp.float32

    x = inputs.reshape(-1, F).astype(f32)        # (M, F), feature dim left unpadded
    M = x.shape[0]

    # Right-size the row tile: no huge padding for tiny M, big lane-dense tiles for
    # large M (and >=2 grid steps so v7x megacore sharding has work to split).
    tm = min(512, _round_up(M, 8))
    Mp = _round_up(M, tm)
    if Mp != M:
        x = jnp.zeros((Mp, F), f32).at[:M, :].set(x)

    grid = (Mp // tm,)

    # Weights/biases counted once (resident across the grid); flops from right-sized Mp.
    cost = pl.CostEstimate(
        flops=2 * Mp * F * Hp + 2 * Mp * Hp * Hp,
        transcendentals=0,
        bytes_accessed=(Mp * F * 4                     # x read
                        + (F * Hp + Hp * Hp + 2 * Hp) * 4   # weights + biases, once
                        + Mp * Hp * 4),                # output write
    )

    out = pl.pallas_call(
        mlp_proto_kernel,
        out_shape=jax.ShapeDtypeStruct((Mp, Hp), f32),
        grid_spec=pltpu.PrefetchScalarGridSpec(
            num_scalar_prefetch=0,
            grid=grid,
            in_specs=[
                pl.BlockSpec((tm, F), lambda i: (i, 0)),    # x tile moves with i
                pl.BlockSpec((F, Hp), lambda i: (0, 0)),    # w1 resident
                pl.BlockSpec((1, Hp), lambda i: (0, 0)),    # b1 resident
                pl.BlockSpec((Hp, Hp), lambda i: (0, 0)),   # w2 resident
                pl.BlockSpec((1, Hp), lambda i: (0, 0)),    # b2 resident
            ],
            out_specs=pl.BlockSpec((tm, Hp), lambda i: (i, 0)),
        ),
        compiler_params=pltpu.CompilerParams(
            dimension_semantics=("parallel",),              # megacore on v7x when grid>=2
            vmem_limit_bytes=32 * 1024 * 1024,              # safe on v5e/v6e/v7x
        ),
        cost_estimate=cost,
    )(x, w1_p, b1_p, w2_p, b2_p)

    return out[:M, :hidden].reshape(B, S, hidden)


def init_params(key, in_features, hidden):
    """Deterministic init mimicking nn.Linear default (uniform +/- 1/sqrt(fan_in))."""
    k1, k2, k3, k4 = jax.random.split(key, 4)
    lim1 = 1.0 / jnp.sqrt(in_features)
    lim2 = 1.0 / jnp.sqrt(hidden)
    w1 = jax.random.uniform(k1, (in_features, hidden), jnp.float32, -lim1, lim1)
    b1 = jax.random.uniform(k2, (hidden,), jnp.float32, -lim1, lim1)
    w2 = jax.random.uniform(k3, (hidden, hidden), jnp.float32, -lim2, lim2)
    b2 = jax.random.uniform(k4, (hidden,), jnp.float32, -lim2, lim2)
    return w1, b1, w2, b2


if __name__ == "__main__":
    # Small shapes: B=2 "ways", S=8 "shots", in_features=16, hidden=32.
    B, S, IN_FEATURES, HIDDEN = 2, 8, 16, 32

    key = jax.random.PRNGKey(0)
    k_x, k_p = jax.random.split(key)
    inputs = jax.random.normal(k_x, (B, S, IN_FEATURES), jnp.float32)
    w1, b1, w2, b2 = init_params(k_p, IN_FEATURES, HIDDEN)

    # Padding/casting of constant params is done ONCE, outside the per-call path.
    w1_p, b1_p, w2_p, b2_p = prepare_params(w1, b1, w2, b2)

    out = mlp_proto_forward(inputs, w1_p, b1_p, w2_p, b2_p, hidden=HIDDEN)
    out = jax.block_until_ready(out)

    # Reference in plain JAX (f32 throughout, matching the PyTorch f32 module).
    x_flat = inputs.reshape(-1, IN_FEATURES)
    h_ref = jnp.maximum(
        jnp.dot(x_flat, w1, preferred_element_type=jnp.float32) + b1, 0.0)
    ref = jnp.dot(h_ref, w2, preferred_element_type=jnp.float32) + b2
    ref = ref.reshape(B, S, HIDDEN)

    assert out.shape == (B, S, HIDDEN)
    assert out.dtype == jnp.float32
    assert jnp.allclose(out, ref, atol=2e-3, rtol=2e-3)

    print("KERNEL_OK")
</pallas_src>

<mosaic_0001>
module attributes {stable_mosaic.version = 11 : i64} {
  func.func @mlp_proto_kernel(%arg0: i32, %arg1: memref<16x16xf32, #tpu.memory_space<vmem>>, %arg2: memref<16x128xf32, #tpu.memory_space<vmem>>, %arg3: memref<1x128xf32, #tpu.memory_space<vmem>>, %arg4: memref<128x128xf32, #tpu.memory_space<vmem>>, %arg5: memref<1x128xf32, #tpu.memory_space<vmem>>, %arg6: memref<16x128xf32, #tpu.memory_space<vmem>>) attributes {dimension_semantics = [#tpu.dimension_semantics<parallel>], iteration_bounds = array<i64: 1>, scalar_prefetch = 0 : i64, scratch_operands = 0 : i64, tpu.core_type = #tpu.core_type<tc>, window_params = [{transform_indices = @transform_0, window_bounds = array<i64: 16, 16>}, {pipeline_mode = #tpu.pipeline_mode<synchronous>, transform_indices = @transform_1, window_bounds = array<i64: 16, 128>}, {pipeline_mode = #tpu.pipeline_mode<synchronous>, transform_indices = @transform_2, window_bounds = array<i64: 1, 128>}, {pipeline_mode = #tpu.pipeline_mode<synchronous>, transform_indices = @transform_3, window_bounds = array<i64: 128, 128>}, {pipeline_mode = #tpu.pipeline_mode<synchronous>, transform_indices = @transform_4, window_bounds = array<i64: 1, 128>}, {transform_indices = @transform_5, window_bounds = array<i64: 16, 128>}]} {
    %c0 = arith.constant 0 : index
    %c0_0 = arith.constant 0 : index
    %0 = vector.load %arg1[%c0, %c0_0] : memref<16x16xf32, #tpu.memory_space<vmem>>, vector<16x16xf32>
    %c0_1 = arith.constant 0 : index
    %c0_2 = arith.constant 0 : index
    %1 = vector.load %arg2[%c0_1, %c0_2] : memref<16x128xf32, #tpu.memory_space<vmem>>, vector<16x128xf32>
    %cst = arith.constant dense<0.000000e+00> : vector<16x128xf32>
    %2 = tpu.matmul %0, %1, %cst {dimension_numbers = #tpu.dot_dimension_numbers<[1], [0], [0], [1], [0, 0, 1, 1], [], []>} : vector<16x16xf32>, vector<16x128xf32>, vector<16x128xf32> -> vector<16x128xf32>
    %c0_3 = arith.constant 0 : index
    %c0_4 = arith.constant 0 : index
    %3 = vector.load %arg3[%c0_3, %c0_4] : memref<1x128xf32, #tpu.memory_space<vmem>>, vector<1x128xf32>
    %4 = vector.broadcast %3 : vector<1x128xf32> to vector<16x128xf32>
    %5 = arith.addf %2, %4 : vector<16x128xf32>
    %cst_5 = arith.constant 0.000000e+00 : f32
    %6 = vector.broadcast %cst_5 : f32 to vector<16x128xf32>
    %7 = arith.maximumf %5, %6 : vector<16x128xf32>
    %c0_6 = arith.constant 0 : index
    %c0_7 = arith.constant 0 : index
    %8 = vector.load %arg4[%c0_6, %c0_7] : memref<128x128xf32, #tpu.memory_space<vmem>>, vector<128x128xf32>
    %cst_8 = arith.constant dense<0.000000e+00> : vector<16x128xf32>
    %9 = tpu.matmul %7, %8, %cst_8 {dimension_numbers = #tpu.dot_dimension_numbers<[1], [0], [0], [1], [0, 0, 1, 1], [], []>} : vector<16x128xf32>, vector<128x128xf32>, vector<16x128xf32> -> vector<16x128xf32>
    %c0_9 = arith.constant 0 : index
    %c0_10 = arith.constant 0 : index
    %10 = vector.load %arg5[%c0_9, %c0_10] : memref<1x128xf32, #tpu.memory_space<vmem>>, vector<1x128xf32>
    %11 = vector.broadcast %10 : vector<1x128xf32> to vector<16x128xf32>
    %12 = arith.addf %9, %11 : vector<16x128xf32>
    %c0_11 = arith.constant 0 : index
    %c0_12 = arith.constant 0 : index
    %13 = vector.load %arg6[%c0_11, %c0_12] : memref<16x128xf32, #tpu.memory_space<vmem>>, vector<16x128xf32>
    tpu.vector_store %arg6[%c0_11, %c0_12], %12 {strides = array<i32>} : memref<16x128xf32, #tpu.memory_space<vmem>>, vector<16x128xf32>,
    return
  }
  func.func @transform_0(%arg0: i32) -> (i32, i32) {
    %c0_i32 = arith.constant 0 : i32
    %c0_i32_0 = arith.constant 0 : i32
    return %arg0, %c0_i32 : i32, i32
  }
  func.func @transform_1(%arg0: i32) -> (i32, i32) {
    %c0_i32 = arith.constant 0 : i32
    %c0_i32_0 = arith.constant 0 : i32
    %c0_i32_1 = arith.constant 0 : i32
    return %c0_i32, %c0_i32_0 : i32, i32
  }
  func.func @transform_2(%arg0: i32) -> (i32, i32) {
    %c0_i32 = arith.constant 0 : i32
    %c0_i32_0 = arith.constant 0 : i32
    %c0_i32_1 = arith.constant 0 : i32
    return %c0_i32, %c0_i32_0 : i32, i32
  }
  func.func @transform_3(%arg0: i32) -> (i32, i32) {
    %c0_i32 = arith.constant 0 : i32
    %c0_i32_0 = arith.constant 0 : i32
    %c0_i32_1 = arith.constant 0 : i32
    return %c0_i32, %c0_i32_0 : i32, i32
  }
  func.func @transform_4(%arg0: i32) -> (i32, i32) {
    %c0_i32 = arith.constant 0 : i32
    %c0_i32_0 = arith.constant 0 : i32
    %c0_i32_1 = arith.constant 0 : i32
    return %c0_i32, %c0_i32_0 : i32, i32
  }
  func.func @transform_5(%arg0: i32) -> (i32, i32) {
    %c0_i32 = arith.constant 0 : i32
    %c0_i32_0 = arith.constant 0 : i32
    return %arg0, %c0_i32 : i32, i32
  }
}

</mosaic_0001>

<bundles_post_ra>
// kernel: mlp_proto_forward.1
= control target key start
LH: loop header
LB: loop body
LE: loop exit
PB: predicated region body
PF: predicated region fallthrough
CT: control target
= control target key end

     0   :  { %10 = vsyncpa [#allocation3], 0  ;;  %s317_s0 = inlined_call_operand.hbm [shape: f32[16,16], index: 0, kind: input, shape index: {}]   ;;  %s318_s1 = inlined_call_operand.hbm [shape: f32[16,128], index: 1, kind: input, shape index: {}]   ;;  %s319_s2 = inlined_call_operand.vmem [shape: f32[1,128], index: 2, kind: input, shape index: {}]   ;;  %s320_s3 = inlined_call_operand.hbm [shape: f32[128,128], index: 3, kind: input, shape index: {}]   ;;  %s321_s4 = inlined_call_operand.vmem [shape: f32[1,128], index: 4, kind: input, shape index: {}]   ;;  %s322_s5 = inlined_call_operand.vmem [shape: f32[16,128], index: 5, kind: output, shape index: {}]  }
   0x1   :  { %11 = vsyncpa [#allocation5], 0  ;;  %s29_s20 = sshll.u32 %s318_s1, 4  ;;  %s259_s21 = smov [#allocation4]   ;;  %s30_s20 = int_to_ptr.hbm [resolvable:$true] %s29_s20 }
   0x2   :  { %s31_s22 = sshll.u32 %s259_s21, 4  ;;  %s16_s25 = sshll.u32 %s317_s0, 4  ;;  %s32_s22 = int_to_ptr.vmem [resolvable:$true] %s31_s22  ;;  %s17_s25 = int_to_ptr.hbm [resolvable:$true] %s16_s25 }
   0x3   :  { %s260_s26 = smov 128   ;;  %s261_s27 = smov 8  }
   0x4   :  { %37 = dma.hbm_to_vmem [thread:$0]  %s30_s20, 256, %s32_s22, [#allocation5], %s260_s26, %s260_s26, %s261_s27  }
   0x5   :  { %s262_s28 = smov [#allocation2]   ;;  %s44_s7 = sshll.u32 %s320_s3, 4  ;;  %s45_s7 = int_to_ptr.hbm [resolvable:$true] %s44_s7 }
   0x6   :  { %s18_s29 = sshll.u32 %s262_s28, 4  ;;  %s263_s1 = smov [#allocation6]   ;;  %s19_s29 = int_to_ptr.vmem [resolvable:$true] %s18_s29 }
   0x7   :  { %24 = dma.hbm_to_vmem [thread:$0]  %s17_s25, 256, %s19_s29, [#allocation3], %s260_s26, %s260_s26, %s261_s27  }
   0x8   :  { %s46_s8 = sshll.u32 %s263_s1, 4  ;;  %s47_s8 = int_to_ptr.vmem [resolvable:$true] %s46_s8 }
   0x9   :  { %52 = dma.hbm_to_vmem [thread:$0]  %s45_s7, 2048, %s47_s8, [#allocation5], %s260_s26, %s260_s26, %s261_s27  }
   0xa   :  { %255 = dma.done.wait [#allocation3], 256  }
   0xb   :  { %256 = vsyncadd [#allocation3], 4294967040 }
   0xc   :  { %257 = dma.done.wait [#allocation5], 2304  }
   0xd   :  { %258 = vsyncadd [#allocation5], 4294964992  ;;  %v70_v0 = vld [vmem:[#allocation4 + $0x8] sm:$0xff]  ;;  %v69_v1 = vld [vmem:[#allocation4] sm:$0xff]  ;;  %vm75_vm0 = vcmask 130048  }
   0xe   :  { %96 = vmatpush.msra.mxu0 %v70_v0  ;;  %v67_v2 = vld [vmem:[#allocation2] sm:$0xff]  ;;  %v122_v3 = vld [vmem:[#allocation6 + $0x78] sm:$0xff]  ;;  %v121_v4 = vld [vmem:[#allocation6 + $0x70] sm:$0xff] }
   0xf   :  { %127 = vmatpush.msra.mxu1 %v122_v3  ;;  %160 = vmatpush.msra.mxu2 %v122_v3  ;;  %v120_v5 = vld [vmem:[#allocation6 + $0x68] sm:$0xff]  ;;  %v119_v6 = vld [vmem:[#allocation6 + $0x60] sm:$0xff]  ;;  %v118_v7 = vld [vmem:[#allocation6 + $0x58] sm:$0xff] }
  0x10   :  { %97 = vmatpush.msra.mxu0 %v69_v1  ;;  %v68_v8 = vld [vmem:[#allocation2 + $0x8] sm:$0xff]  ;;  %v117_v9 = vld [vmem:[#allocation6 + $0x50] sm:$0xff]  ;;  %v115_v11 = vld [vmem:[#allocation6 + $0x40] sm:$0xff] }
  0x11   :  { %158 = vmatmul.msk.f32.vlgmr.msra.gmra.mxu0 %vm75_vm0, %v67_v2  ;;  %128 = vmatpush.msra.mxu1 %v121_v4  ;;  %v116_v10 = vld [vmem:[#allocation6 + $0x48] sm:$0xff]  ;;  %v114_v12 = vld [vmem:[#allocation6 + $0x38] sm:$0xff]  ;;  %v113_v13 = vld [vmem:[#allocation6 + $0x30] sm:$0xff] }
  0x12   :  { %161 = vmatpush.msra.mxu2 %v121_v4  ;;  %v112_v14 = vld [vmem:[#allocation6 + $0x28] sm:$0xff]  ;;  %v111_v15 = vld [vmem:[#allocation6 + $0x20] sm:$0xff]  ;;  %v110_v16 = vld [vmem:[#allocation6 + $0x18] sm:$0xff] }
  0x13   :  { %129 = vmatpush.msra.mxu1 %v120_v5  ;;  %v109_v17 = vld [vmem:[#allocation6 + $0x10] sm:$0xff]  ;;  %v108_v18 = vld [vmem:[#allocation6 + $0x8] sm:$0xff]  ;;  %v107_v19 = vld [vmem:[#allocation6] sm:$0xff] }
  0x14   :  { %162 = vmatpush.msra.mxu2 %v120_v5  ;;  %v181_v20 = vld [vmem:[%s319_s2] ss:$0 sm:$0xff] }
  0x15   :  { %130 = vmatpush.msra.mxu1 %v119_v6  ;;  %v182_v27 = vld [vmem:[%s321_s4] ss:$0 sm:$0xff] }
  0x16   :  { %163 = vmatpush.msra.mxu2 %v119_v6 }
  0x17   :  { %131 = vmatpush.msra.mxu1 %v118_v7 }
  0x18   :  { %164 = vmatpush.msra.mxu2 %v118_v7 }
  0x19   :  { %159 = vmatmul.msk.f32.gmra.mxu0 %vm75_vm0, %v68_v8  ;;  %132 = vmatpush.msra.mxu1 %v117_v9 }
  0x1a   :  { %165 = vmatpush.msra.mxu2 %v117_v9 }
  0x1b   :  { %133 = vmatpush.msra.mxu1 %v116_v10 }
  0x1c   :  { %166 = vmatpush.msra.mxu2 %v116_v10 }
  0x1d   :  { %134 = vmatpush.msra.mxu1 %v115_v11 }
  0x1e   :  { %167 = vmatpush.msra.mxu2 %v115_v11 }
  0x1f   :  { %135 = vmatpush.msra.mxu1 %v114_v12 }
  0x20   :  { %168 = vmatpush.msra.mxu2 %v114_v12 }
  0x21   :  { %136 = vmatpush.msra.mxu1 %v113_v13 }
  0x22   :  { %169 = vmatpush.msra.mxu2 %v113_v13 }
  0x23   :  { %137 = vmatpush.msra.mxu1 %v112_v14 }
  0x24   :  { %170 = vmatpush.msra.mxu2 %v112_v14 }
  0x25   :  { %138 = vmatpush.msra.mxu1 %v111_v15 }
  0x26   :  { %171 = vmatpush.msra.mxu2 %v111_v15 }
  0x27   :  { %139 = vmatpush.msra.mxu1 %v110_v16 }
  0x28   :  { %172 = vmatpush.msra.mxu2 %v110_v16 }
  0x29   :  { %140 = vmatpush.msra.mxu1 %v109_v17 }
  0x2a   :  { %173 = vmatpush.msra.mxu2 %v109_v17 }
  0x2b   :  { %141 = vmatpush.msra.mxu1 %v108_v18 }
  0x2c   :  { %174 = vmatpush.msra.mxu2 %v108_v18 }
  0x2d   :  { %142 = vmatpush.msra.mxu1 %v107_v19 }
  0x2e   :  { %175 = vmatpush.msra.mxu2 %v107_v19 }
  0x8e   :  { %v99_v21 = vpop.f32.mrf.mxu0 }
  0x8f   :  { %v100_v22 = vadd.f32 %v181_v20, %v99_v21 }
  0x91   :  { %v105_v23 = vmax.f32 %v100_v22, 0.0 }
  0x93   :  { %143 = vmatmul.f32.vlgmr.msra.gmra.mxu1 %v105_v23 }
  0x96   :  { %v102_v24 = vpop.f32.mrf.mxu0 }
  0x97   :  { %v103_v25 = vadd.f32 %v181_v20, %v102_v24 }
  0x99   :  { %v106_v26 = vmax.f32 %v103_v25, 0.0 }
  0x9b   :  { %146 = vmatmul.f32.vlgmr.msra.gmra.mxu2 %v106_v26 }
 0x110   :  { %v144_v28 = vpop.f32.mrf.mxu1 }
 0x111   :  { %v145_v29 = vadd.f32 %v182_v27, %v144_v28 }
 0x113   :  { %150 = vst [vmem:[%s322_s5] sm:$0xff] %v145_v29 }
 0x11e   :  { %v147_v30 = vpop.f32.mrf.mxu2 }
 0x11f   :  { %v148_v31 = vadd.f32 %v182_v27, %v147_v30 }
 0x121   :  { %151 = vst [vmem:[%s322_s5 + $0x8] sm:$0xff] %v148_v31 }
 0x122   :  { %156 = vsyncpa [#allocation3], 1 }
 0x123   :  { %157 = vsyncpa [#allocation5], 1 }

</bundles_post_ra>
